<compile_context>
chip_gen: v6e
topology: v6e:2x2x1
jax: 0.10.0
libtpu: 0.0.40
codegen_flags: <defaults>
</compile_context>

<pallas_src>
import functools

import jax
import jax.numpy as jnp
from jax.experimental import pallas as pl
from jax.experimental.pallas import tpu as pltpu

IN_DIM = 561
HID_DIM = 250
OUT_DIM = 6
BN_EPS = 1e-5

# Padded, hardware-friendly sizes (multiples of 128 on the lane axis).
IN_PAD = 640
HID_PAD = 256
OUT_PAD = 128

MAX_TILE_B = 512  # rows per grid step; fits VMEM comfortably even on v7x.


def _round_up(n, m):
    return ((n + m - 1) // m) * m


def quickmodel_kernel(x_ref, w1_ref, s1_ref, w2_ref, b2_ref, o_ref):
    # fc1 (+ folded BN affine) + ReLU:  (TILE_B, 640) @ (640, 256)
    h = jnp.dot(x_ref[...], w1_ref[...], preferred_element_type=jnp.float32)
    h = jnp.maximum(h + s1_ref[...], 0.0)
    # dropout (eval): identity
    # fc2 (lane-dense padded output):  (TILE_B, 256) @ (256, 128)
    out = jnp.dot(h, w2_ref[...], preferred_element_type=jnp.float32)
    o_ref[...] = (out + b2_ref[...]).astype(o_ref.dtype)


def prepare_params(params):
    """One-time parameter transform: fold BN (eval) into fc1, pad to aligned shapes."""
    w1, b1, gamma, beta, running_mean, running_var, w2, b2 = params
    scale = gamma / jnp.sqrt(running_var + BN_EPS)        # (250,)
    shift = beta - running_mean * scale                   # (250,)
    w1_folded = w1 * scale[None, :]                       # (561, 250)
    s1_folded = b1 * scale + shift                        # (250,)

    w1p = jnp.zeros((IN_PAD, HID_PAD), jnp.float32).at[:IN_DIM, :HID_DIM].set(w1_folded)
    s1p = jnp.zeros((1, HID_PAD), jnp.float32).at[0, :HID_DIM].set(s1_folded)
    w2p = jnp.zeros((HID_PAD, OUT_PAD), jnp.float32).at[:HID_DIM, :OUT_DIM].set(w2)
    b2p = jnp.zeros((1, OUT_PAD), jnp.float32).at[0, :OUT_DIM].set(b2)
    return w1p, s1p, w2p, b2p


@functools.partial(jax.jit, static_argnames=("tile_b",))
def _forward_padded(xp, w1p, s1p, w2p, b2p, *, tile_b):
    b_pad = xp.shape[0]
    grid = (b_pad // tile_b,)
    return pl.pallas_call(
        quickmodel_kernel,
        out_shape=jax.ShapeDtypeStruct((b_pad, OUT_PAD), jnp.float32),
        grid_spec=pltpu.PrefetchScalarGridSpec(
            num_scalar_prefetch=0,
            grid=grid,
            in_specs=[
                pl.BlockSpec((tile_b, IN_PAD), lambda i: (i, 0)),    # x tile (pipelined)
                pl.BlockSpec((IN_PAD, HID_PAD), lambda i: (0, 0)),   # w1' resident
                pl.BlockSpec((1, HID_PAD), lambda i: (0, 0)),        # folded bias/shift
                pl.BlockSpec((HID_PAD, OUT_PAD), lambda i: (0, 0)),  # w2 resident
                pl.BlockSpec((1, OUT_PAD), lambda i: (0, 0)),        # b2
            ],
            out_specs=pl.BlockSpec((tile_b, OUT_PAD), lambda i: (i, 0)),
        ),
        compiler_params=pltpu.CompilerParams(
            dimension_semantics=("parallel",),
        ),
    )(xp, w1p, s1p, w2p, b2p)


def quickmodel_forward(x, prepared_params):
    """x: (B, 561) float32. Returns (B, 6) float32."""
    w1p, s1p, w2p, b2p = prepared_params
    B = x.shape[0]

    # Pick the batch tile: multiple of 8, capped so VMEM stays small and the
    # grid gives the pipeline (and v7x's two TCs) something to chew on.
    tile_b = min(MAX_TILE_B, _round_up(B, 8))
    b_pad = _round_up(B, tile_b)

    # Zero-pad batch (tail tile) and features (561 -> 640). Zeros are exact:
    # padded K columns of w1' are zero, padded hidden units feed zero rows of w2.
    xp = jnp.zeros((b_pad, IN_PAD), jnp.float32).at[:B, :IN_DIM].set(x)

    out = _forward_padded(xp, w1p, s1p, w2p, b2p, tile_b=tile_b)
    return out[:B, :OUT_DIM]


def init_params(key):
    """Deterministic synthetic parameters matching nn.Module shapes."""
    k1, k2, k3, k4, k5, k6 = jax.random.split(key, 6)
    # fc1: PyTorch stores (250, 561); we keep the transpose (561, 250).
    w1 = jax.random.normal(k1, (IN_DIM, HID_DIM), jnp.float32) * 0.05
    b1 = jax.random.normal(k2, (HID_DIM,), jnp.float32) * 0.05
    # bn1 parameters + running stats (synthetic but deterministic)
    gamma = 1.0 + 0.1 * jax.random.normal(k3, (HID_DIM,), jnp.float32)
    beta = 0.1 * jax.random.normal(k4, (HID_DIM,), jnp.float32)
    running_mean = 0.1 * jax.random.normal(k5, (HID_DIM,), jnp.float32)
    running_var = jnp.ones((HID_DIM,), jnp.float32)
    # fc2: PyTorch stores (6, 250); we keep the transpose (250, 6).
    w2 = jax.random.normal(k6, (HID_DIM, OUT_DIM), jnp.float32) * 0.05
    b2 = jnp.zeros((OUT_DIM,), jnp.float32)
    return (w1, b1, gamma, beta, running_mean, running_var, w2, b2)


def reference_forward(x, params):
    """Pure-JAX reference of the same eval-mode forward pass."""
    w1, b1, gamma, beta, running_mean, running_var, w2, b2 = params
    h = x @ w1 + b1
    h = (h - running_mean) / jnp.sqrt(running_var + BN_EPS) * gamma + beta
    h = jnp.maximum(h, 0.0)
    return h @ w2 + b2


if __name__ == "__main__":
    key = jax.random.PRNGKey(0)
    kx, kp = jax.random.split(key)
    batch = 8
    x = jax.random.normal(kx, (batch, IN_DIM), jnp.float32)
    params = init_params(kp)
    prepared = prepare_params(params)

    out = quickmodel_forward(x, prepared)
    out = jax.block_until_ready(out)

    ref = reference_forward(x, params)
    assert out.shape == (batch, OUT_DIM)
    assert jnp.allclose(out, ref, atol=1e-4, rtol=1e-4), (
        f"max abs err = {jnp.max(jnp.abs(out - ref))}")

    # Also exercise a batch that is not a tile multiple (tail-tile padding path).
    x2 = jax.random.normal(jax.random.PRNGKey(1), (37, IN_DIM), jnp.float32)
    out2 = jax.block_until_ready(quickmodel_forward(x2, prepared))
    ref2 = reference_forward(x2, params)
    assert out2.shape == (37, OUT_DIM)
    assert jnp.allclose(out2, ref2, atol=1e-4, rtol=1e-4), (
        f"max abs err = {jnp.max(jnp.abs(out2 - ref2))}")

    print("KERNEL_OK")
</pallas_src>

<mosaic_0001>
module attributes {stable_mosaic.version = 11 : i64} {
  func.func @quickmodel_kernel(%arg0: i32, %arg1: memref<8x640xf32, #tpu.memory_space<vmem>>, %arg2: memref<640x256xf32, #tpu.memory_space<vmem>>, %arg3: memref<1x256xf32, #tpu.memory_space<vmem>>, %arg4: memref<256x128xf32, #tpu.memory_space<vmem>>, %arg5: memref<1x128xf32, #tpu.memory_space<vmem>>, %arg6: memref<8x128xf32, #tpu.memory_space<vmem>>) attributes {dimension_semantics = [#tpu.dimension_semantics<parallel>], iteration_bounds = array<i64: 1>, scalar_prefetch = 0 : i64, scratch_operands = 0 : i64, tpu.core_type = #tpu.core_type<tc>, window_params = [{transform_indices = @transform_0, window_bounds = array<i64: 8, 640>}, {pipeline_mode = #tpu.pipeline_mode<synchronous>, transform_indices = @transform_1, window_bounds = array<i64: 640, 256>}, {pipeline_mode = #tpu.pipeline_mode<synchronous>, transform_indices = @transform_2, window_bounds = array<i64: 1, 256>}, {pipeline_mode = #tpu.pipeline_mode<synchronous>, transform_indices = @transform_3, window_bounds = array<i64: 256, 128>}, {pipeline_mode = #tpu.pipeline_mode<synchronous>, transform_indices = @transform_4, window_bounds = array<i64: 1, 128>}, {transform_indices = @transform_5, window_bounds = array<i64: 8, 128>}]} {
    %c0 = arith.constant 0 : index
    %c0_0 = arith.constant 0 : index
    %0 = vector.load %arg1[%c0, %c0_0] : memref<8x640xf32, #tpu.memory_space<vmem>>, vector<8x640xf32>
    %c0_1 = arith.constant 0 : index
    %c0_2 = arith.constant 0 : index
    %1 = vector.load %arg2[%c0_1, %c0_2] : memref<640x256xf32, #tpu.memory_space<vmem>>, vector<640x256xf32>
    %cst = arith.constant dense<0.000000e+00> : vector<8x256xf32>
    %2 = tpu.matmul %0, %1, %cst {dimension_numbers = #tpu.dot_dimension_numbers<[1], [0], [0], [1], [0, 0, 1, 1], [], []>} : vector<8x640xf32>, vector<640x256xf32>, vector<8x256xf32> -> vector<8x256xf32>
    %c0_3 = arith.constant 0 : index
    %c0_4 = arith.constant 0 : index
    %3 = vector.load %arg3[%c0_3, %c0_4] : memref<1x256xf32, #tpu.memory_space<vmem>>, vector<1x256xf32>
    %4 = vector.broadcast %3 : vector<1x256xf32> to vector<8x256xf32>
    %5 = arith.addf %2, %4 : vector<8x256xf32>
    %cst_5 = arith.constant 0.000000e+00 : f32
    %6 = vector.broadcast %cst_5 : f32 to vector<8x256xf32>
    %7 = arith.maximumf %5, %6 : vector<8x256xf32>
    %c0_6 = arith.constant 0 : index
    %c0_7 = arith.constant 0 : index
    %8 = vector.load %arg4[%c0_6, %c0_7] : memref<256x128xf32, #tpu.memory_space<vmem>>, vector<256x128xf32>
    %cst_8 = arith.constant dense<0.000000e+00> : vector<8x128xf32>
    %9 = tpu.matmul %7, %8, %cst_8 {dimension_numbers = #tpu.dot_dimension_numbers<[1], [0], [0], [1], [0, 0, 1, 1], [], []>} : vector<8x256xf32>, vector<256x128xf32>, vector<8x128xf32> -> vector<8x128xf32>
    %c0_9 = arith.constant 0 : index
    %c0_10 = arith.constant 0 : index
    %10 = vector.load %arg5[%c0_9, %c0_10] : memref<1x128xf32, #tpu.memory_space<vmem>>, vector<1x128xf32>
    %11 = vector.broadcast %10 : vector<1x128xf32> to vector<8x128xf32>
    %12 = arith.addf %9, %11 : vector<8x128xf32>
    %c0_11 = arith.constant 0 : index
    %c0_12 = arith.constant 0 : index
    %13 = vector.load %arg6[%c0_11, %c0_12] : memref<8x128xf32, #tpu.memory_space<vmem>>, vector<8x128xf32>
    tpu.vector_store %arg6[%c0_11, %c0_12], %12 {strides = array<i32>} : memref<8x128xf32, #tpu.memory_space<vmem>>, vector<8x128xf32>,
    return
  }
  func.func @transform_0(%arg0: i32) -> (i32, i32) {
    %c0_i32 = arith.constant 0 : i32
    %c0_i32_0 = arith.constant 0 : i32
    return %arg0, %c0_i32 : i32, i32
  }
  func.func @transform_1(%arg0: i32) -> (i32, i32) {
    %c0_i32 = arith.constant 0 : i32
    %c0_i32_0 = arith.constant 0 : i32
    %c0_i32_1 = arith.constant 0 : i32
    return %c0_i32, %c0_i32_0 : i32, i32
  }
  func.func @transform_2(%arg0: i32) -> (i32, i32) {
    %c0_i32 = arith.constant 0 : i32
    %c0_i32_0 = arith.constant 0 : i32
    %c0_i32_1 = arith.constant 0 : i32
    return %c0_i32, %c0_i32_0 : i32, i32
  }
  func.func @transform_3(%arg0: i32) -> (i32, i32) {
    %c0_i32 = arith.constant 0 : i32
    %c0_i32_0 = arith.constant 0 : i32
    %c0_i32_1 = arith.constant 0 : i32
    return %c0_i32, %c0_i32_0 : i32, i32
  }
  func.func @transform_4(%arg0: i32) -> (i32, i32) {
    %c0_i32 = arith.constant 0 : i32
    %c0_i32_0 = arith.constant 0 : i32
    %c0_i32_1 = arith.constant 0 : i32
    return %c0_i32, %c0_i32_0 : i32, i32
  }
  func.func @transform_5(%arg0: i32) -> (i32, i32) {
    %c0_i32 = arith.constant 0 : i32
    %c0_i32_0 = arith.constant 0 : i32
    return %arg0, %c0_i32 : i32, i32
  }
}

</mosaic_0001>

<bundles_post_ra>
// kernel: _forward_padded.1
= control target key start
LH: loop header
LB: loop body
LE: loop exit
PB: predicated region body
PF: predicated region fallthrough
CT: control target
= control target key end

     0   :  { %10 = vsyncpa [#allocation3], 0  ;;  %s766_s0 = inlined_call_operand.hbm [shape: f32[8,640], index: 0, kind: input, shape index: {}]   ;;  %s767_s1 = inlined_call_operand.hbm [shape: f32[640,256], index: 1, kind: input, shape index: {}]   ;;  %s768_s2 = inlined_call_operand.vmem [shape: f32[1,256], index: 2, kind: input, shape index: {}]   ;;  %s769_s3 = inlined_call_operand.hbm [shape: f32[256,128], index: 3, kind: input, shape index: {}]   ;;  %s770_s4 = inlined_call_operand.vmem [shape: f32[1,128], index: 4, kind: input, shape index: {}]   ;;  %s771_s5 = inlined_call_operand.hbm [shape: f32[8,128], index: 5, kind: output, shape index: {}]  }
   0x1   :  { %11 = vsyncpa [#allocation6], 0 }
   0x2   :  { %12 = vsyncpa [#allocation4], 0  ;;  %s709_s18 = smov [#allocation5]  }
   0x3   :  { %s28_s19 = sshll.u32 %s709_s18, 4  ;;  %s29_s19 = int_to_ptr.vmem [resolvable:$true] %s28_s19 }
   0x4   :  { %s631_s20 = scalar_lea.vmem %s29_s19, 20480  ;;  %p636_p1 = scmp.lt.s32.totalorder %s29_s19, %s29_s19 }
   0x5   :  { %p632_p0 = scmp.ne.s32.totalorder %s29_s19, %s631_s20  ;;  %p637_p2 = scmp.lt.s32.totalorder %s631_s20, %s631_s20 }
   0x7   :  { %p638_p3 = por %p637_p2, %p636_p1 }
   0x9   :  { %p639_p4 = pnand %p638_p3, %p632_p0 }
   0xb   :  { %642 = shalt.err (!%p639_p4)
}
   0xc   :  { %s710_s21 = smov 256   ;;  %s711_s22 = smov 16  }
   0xd   :  { %34 = dma.hbm_to_vmem [thread:$0]  %s767_s1, 20480, %s29_s19, [#allocation6], %s710_s21, %s710_s21, %s711_s22  }
   0xe   :  { %s712_s25 = smov [#allocation2]   ;;  %s713_s27 = smov [#allocation7]  }
   0xf   :  { %s19_s26 = sshll.u32 %s712_s25, 4  ;;  %s42_s28 = sshll.u32 %s713_s27, 4  ;;  %s20_s26 = int_to_ptr.vmem [resolvable:$true] %s19_s26  ;;  %s43_s28 = int_to_ptr.vmem [resolvable:$true] %s42_s28 }
  0x10   :  { %s651_s29 = scalar_lea.vmem %s20_s26, 640  ;;  %p656_p6 = scmp.lt.s32.totalorder %s20_s26, %s20_s26 }
  0x11   :  { %p652_p5 = scmp.ne.s32.totalorder %s20_s26, %s651_s29  ;;  %p657_p7 = scmp.lt.s32.totalorder %s651_s29, %s651_s29 }
  0x13   :  { %p658_p8 = por %p657_p7, %p656_p6 }
  0x15   :  { %p659_p9 = pnand %p658_p8, %p652_p5 }
  0x17   :  { %662 = shalt.err (!%p659_p9)
}
  0x18   :  { %22 = dma.hbm_to_vmem [thread:$0]  %s766_s0, 640, %s20_s26, [#allocation3]  }
  0x19   :  { %s671_s7 = scalar_lea.vmem %s43_s28, 4096  ;;  %p676_p11 = scmp.lt.s32.totalorder %s43_s28, %s43_s28 }
  0x1a   :  { %p672_p10 = scmp.ne.s32.totalorder %s43_s28, %s671_s7  ;;  %p677_p12 = scmp.lt.s32.totalorder %s671_s7, %s671_s7 }
  0x1c   :  { %p678_p13 = por %p677_p12, %p676_p11 }
  0x1e   :  { %p679_p0 = pnand %p678_p13, %p672_p10 }
  0x20   :  { %682 = shalt.err (!%p679_p0)
}
  0x21   :  { %s714_s1 = smov 128   ;;  %s715_s8 = smov 8  }
  0x22   :  { %48 = dma.hbm_to_vmem [thread:$0]  %s769_s3, 4096, %s43_s28, [#allocation6], %s714_s1, %s714_s1, %s715_s8  }
  0x23   :  { %703 = dma.done.wait [#allocation3], 640  }
  0x24   :  { %704 = vsyncadd [#allocation3], 4294966656 }
  0x25   :  { %705 = dma.done.wait [#allocation6], 24576  }
  0x26   :  { %706 = vsyncadd [#allocation6], 4294942720  ;;  %v96_v0 = vld [vmem:[#allocation5 + $0xf8] sm:$0xff]  ;;  %v95_v1 = vld [vmem:[#allocation5 + $0xf0] sm:$0xff]  ;;  %s717_s12 = smov [#allocation8]  }
  0x27   :  { %v94_v2 = vld [vmem:[#allocation5 + $0xe8] sm:$0xff]  ;;  %237 = vmatprep.subr.mxu0 %v96_v0  ;;  %v160_v3 = vld [vmem:[#allocation5 + $0x2f8] sm:$0xff]  ;;  %v93_v4 = vld [vmem:[#allocation5 + $0xe0] sm:$0xff]  ;;  %s568_s13 = sshll.u32 %s717_s12, 4  ;;  %s569_s13 = int_to_ptr.vmem [resolvable:$true] %s568_s13 }
  0x28   :  { %v159_v5 = vld [vmem:[#allocation5 + $0x2f0] sm:$0xff]  ;;  %238 = vmatpush1.msra.mxu0 %v95_v1  ;;  %308 = vmatprep.subr.mxu1 %v160_v3  ;;  %v92_v6 = vld [vmem:[#allocation5 + $0xd8] sm:$0xff]  ;;  %v158_v7 = vld [vmem:[#allocation5 + $0x2e8] sm:$0xff]  ;;  %s683_s14 = scalar_lea.vmem %s569_s13, 128  ;;  %p688_p2 = scmp.lt.s32.totalorder %s569_s13, %s569_s13 }
  0x29   :  { %239 = vmatprep.subr.mxu0 %v94_v2  ;;  %309 = vmatpush1.msra.mxu1 %v159_v5  ;;  %v91_v8 = vld [vmem:[#allocation5 + $0xd0] sm:$0xff]  ;;  %v157_v9 = vld [vmem:[#allocation5 + $0x2e0] sm:$0xff]  ;;  %v156_v10 = vld [vmem:[#allocation5 + $0x2d8] sm:$0xff]  ;;  %p684_p1 = scmp.ne.s32.totalorder %s569_s13, %s683_s14  ;;  %p689_p3 = scmp.lt.s32.totalorder %s683_s14, %s683_s14 }
  0x2a   :  { %240 = vmatpush1.msra.mxu0 %v93_v4  ;;  %310 = vmatprep.subr.mxu1 %v158_v7  ;;  %v90_v11 = vld [vmem:[#allocation5 + $0xc8] sm:$0xff]  ;;  %v155_v12 = vld [vmem:[#allocation5 + $0x2d0] sm:$0xff]  ;;  %v89_v13 = vld [vmem:[#allocation5 + $0xc0] sm:$0xff] }
  0x2b   :  { %241 = vmatprep.subr.mxu0 %v92_v6  ;;  %311 = vmatpush1.msra.mxu1 %v157_v9  ;;  %v154_v14 = vld [vmem:[#allocation5 + $0x2c8] sm:$0xff]  ;;  %v88_v15 = vld [vmem:[#allocation5 + $0xb8] sm:$0xff]  ;;  %v153_v16 = vld [vmem:[#allocation5 + $0x2c0] sm:$0xff]  ;;  %p690_p4 = por %p689_p3, %p688_p2 }
  0x2c   :  { %242 = vmatpush1.msra.mxu0 %v91_v8  ;;  %312 = vmatprep.subr.mxu1 %v156_v10  ;;  %v87_v17 = vld [vmem:[#allocation5 + $0xb0] sm:$0xff]  ;;  %v152_v18 = vld [vmem:[#allocation5 + $0x2b8] sm:$0xff]  ;;  %v86_v19 = vld [vmem:[#allocation5 + $0xa8] sm:$0xff] }
  0x2d   :  { %243 = vmatprep.subr.mxu0 %v90_v11  ;;  %313 = vmatpush1.msra.mxu1 %v155_v12  ;;  %v151_v20 = vld [vmem:[#allocation5 + $0x2b0] sm:$0xff]  ;;  %v85_v21 = vld [vmem:[#allocation5 + $0xa0] sm:$0xff]  ;;  %v150_v22 = vld [vmem:[#allocation5 + $0x2a8] sm:$0xff]  ;;  %p691_p5 = pnand %p690_p4, %p684_p1 }
  0x2e   :  { %244 = vmatpush1.msra.mxu0 %v89_v13  ;;  %314 = vmatprep.subr.mxu1 %v154_v14  ;;  %v84_v23 = vld [vmem:[#allocation5 + $0x98] sm:$0xff]  ;;  %v149_v24 = vld [vmem:[#allocation5 + $0x2a0] sm:$0xff]  ;;  %v83_v25 = vld [vmem:[#allocation5 + $0x90] sm:$0xff] }
  0x2f   :  { %245 = vmatprep.subr.mxu0 %v88_v15  ;;  %315 = vmatpush1.msra.mxu1 %v153_v16  ;;  %v148_v26 = vld [vmem:[#allocation5 + $0x298] sm:$0xff]  ;;  %v82_v27 = vld [vmem:[#allocation5 + $0x88] sm:$0xff]  ;;  %v147_v28 = vld [vmem:[#allocation5 + $0x290] sm:$0xff] }
  0x30   :  { %246 = vmatpush1.msra.mxu0 %v87_v17  ;;  %316 = vmatprep.subr.mxu1 %v152_v18  ;;  %v81_v29 = vld [vmem:[#allocation5 + $0x80] sm:$0xff]  ;;  %v146_v30 = vld [vmem:[#allocation5 + $0x288] sm:$0xff]  ;;  %v80_v31 = vld [vmem:[#allocation5 + $0x78] sm:$0xff] }
  0x31   :  { %247 = vmatprep.subr.mxu0 %v86_v19  ;;  %317 = vmatpush1.msra.mxu1 %v151_v20  ;;  %v145_v32 = vld [vmem:[#allocation5 + $0x280] sm:$0xff]  ;;  %v79_v33 = vld [vmem:[#allocation5 + $0x70] sm:$0xff]  ;;  %v144_v34 = vld [vmem:[#allocation5 + $0x278] sm:$0xff] }
  0x32   :  { %248 = vmatpush1.msra.mxu0 %v85_v21  ;;  %318 = vmatprep.subr.mxu1 %v150_v22  ;;  %v78_v35 = vld [vmem:[#allocation5 + $0x68] sm:$0xff]  ;;  %v143_v36 = vld [vmem:[#allocation5 + $0x270] sm:$0xff]  ;;  %v77_v37 = vld [vmem:[#allocation5 + $0x60] sm:$0xff] }
  0x33   :  { %249 = vmatprep.subr.mxu0 %v84_v23  ;;  %319 = vmatpush1.msra.mxu1 %v149_v24  ;;  %v142_v38 = vld [vmem:[#allocation5 + $0x268] sm:$0xff]  ;;  %v76_v39 = vld [vmem:[#allocation5 + $0x58] sm:$0xff]  ;;  %v141_v40 = vld [vmem:[#allocation5 + $0x260] sm:$0xff] }
  0x34   :  { %250 = vmatpush1.msra.mxu0 %v83_v25  ;;  %320 = vmatprep.subr.mxu1 %v148_v26  ;;  %v75_v41 = vld [vmem:[#allocation5 + $0x50] sm:$0xff]  ;;  %v140_v42 = vld [vmem:[#allocation5 + $0x258] sm:$0xff]  ;;  %v74_v43 = vld [vmem:[#allocation5 + $0x48] sm:$0xff] }
  0x35   :  { %251 = vmatprep.subr.mxu0 %v82_v27  ;;  %321 = vmatpush1.msra.mxu1 %v147_v28  ;;  %v139_v44 = vld [vmem:[#allocation5 + $0x250] sm:$0xff]  ;;  %v73_v45 = vld [vmem:[#allocation5 + $0x40] sm:$0xff]  ;;  %v138_v46 = vld [vmem:[#allocation5 + $0x248] sm:$0xff] }
  0x36   :  { %252 = vmatpush1.msra.mxu0 %v81_v29  ;;  %322 = vmatprep.subr.mxu1 %v146_v30  ;;  %v72_v47 = vld [vmem:[#allocation5 + $0x38] sm:$0xff]  ;;  %v137_v48 = vld [vmem:[#allocation5 + $0x240] sm:$0xff]  ;;  %v71_v49 = vld [vmem:[#allocation5 + $0x30] sm:$0xff] }
  0x37   :  { %253 = vmatprep.subr.mxu0 %v80_v31  ;;  %323 = vmatpush1.msra.mxu1 %v145_v32  ;;  %v136_v50 = vld [vmem:[#allocation5 + $0x238] sm:$0xff]  ;;  %v70_v51 = vld [vmem:[#allocation5 + $0x28] sm:$0xff]  ;;  %v135_v52 = vld [vmem:[#allocation5 + $0x230] sm:$0xff] }
  0x38   :  { %254 = vmatpush1.msra.mxu0 %v79_v33  ;;  %324 = vmatprep.subr.mxu1 %v144_v34  ;;  %v69_v53 = vld [vmem:[#allocation5 + $0x20] sm:$0xff]  ;;  %v134_v54 = vld [vmem:[#allocation5 + $0x228] sm:$0xff]  ;;  %v68_v55 = vld [vmem:[#allocation5 + $0x18] sm:$0xff] }
  0x39   :  { %255 = vmatprep.subr.mxu0 %v78_v35  ;;  %325 = vmatpush1.msra.mxu1 %v143_v36  ;;  %v133_v56 = vld [vmem:[#allocation5 + $0x220] sm:$0xff]  ;;  %v67_v57 = vld [vmem:[#allocation5 + $0x10] sm:$0xff]  ;;  %v132_v58 = vld [vmem:[#allocation5 + $0x218] sm:$0xff] }
  0x3a   :  { %256 = vmatpush1.msra.mxu0 %v77_v37  ;;  %326 = vmatprep.subr.mxu1 %v142_v38  ;;  %v66_v59 = vld [vmem:[#allocation5 + $0x8] sm:$0xff]  ;;  %v131_v60 = vld [vmem:[#allocation5 + $0x210] sm:$0xff]  ;;  %v65_v61 = vld [vmem:[#allocation5] sm:$0xff] }
  0x3b   :  { %257 = vmatprep.subr.mxu0 %v76_v39  ;;  %327 = vmatpush1.msra.mxu1 %v141_v40  ;;  %v130_v62 = vld [vmem:[#allocation5 + $0x208] sm:$0xff]  ;;  %v128_v63 = vld [vmem:[#allocation5 + $0x1f8] sm:$0xff]  ;;  %v129_v0 = vld [vmem:[#allocation5 + $0x200] sm:$0xff] }
  0x3c   :  { %258 = vmatpush1.msra.mxu0 %v75_v41  ;;  %328 = vmatprep.subr.mxu1 %v140_v42  ;;  %v127_v1 = vld [vmem:[#allocation5 + $0x1f0] sm:$0xff]  ;;  %v192_v2 = vld [vmem:[#allocation5 + $0x3f8] sm:$0xff]  ;;  %v126_v3 = vld [vmem:[#allocation5 + $0x1e8] sm:$0xff] }
  0x3d   :  { %259 = vmatprep.subr.mxu0 %v74_v43  ;;  %329 = vmatpush1.msra.mxu1 %v139_v44  ;;  %v191_v4 = vld [vmem:[#allocation5 + $0x3f0] sm:$0xff]  ;;  %v125_v5 = vld [vmem:[#allocation5 + $0x1e0] sm:$0xff]  ;;  %v190_v6 = vld [vmem:[#allocation5 + $0x3e8] sm:$0xff] }
  0x3e   :  { %260 = vmatpush1.msra.mxu0 %v73_v45  ;;  %330 = vmatprep.subr.mxu1 %v138_v46  ;;  %v124_v7 = vld [vmem:[#allocation5 + $0x1d8] sm:$0xff]  ;;  %v189_v8 = vld [vmem:[#allocation5 + $0x3e0] sm:$0xff]  ;;  %v123_v9 = vld [vmem:[#allocation5 + $0x1d0] sm:$0xff] }
  0x3f   :  { %261 = vmatprep.subr.mxu0 %v72_v47  ;;  %331 = vmatpush1.msra.mxu1 %v137_v48  ;;  %v188_v10 = vld [vmem:[#allocation5 + $0x3d8] sm:$0xff]  ;;  %v122_v11 = vld [vmem:[#allocation5 + $0x1c8] sm:$0xff]  ;;  %v187_v12 = vld [vmem:[#allocation5 + $0x3d0] sm:$0xff] }
  0x40   :  { %262 = vmatpush1.msra.mxu0 %v71_v49  ;;  %332 = vmatprep.subr.mxu1 %v136_v50  ;;  %v121_v13 = vld [vmem:[#allocation5 + $0x1c0] sm:$0xff]  ;;  %v186_v14 = vld [vmem:[#allocation5 + $0x3c8] sm:$0xff]  ;;  %v120_v15 = vld [vmem:[#allocation5 + $0x1b8] sm:$0xff] }
  0x41   :  { %263 = vmatprep.subr.mxu0 %v70_v51  ;;  %333 = vmatpush1.msra.mxu1 %v135_v52  ;;  %v185_v16 = vld [vmem:[#allocation5 + $0x3c0] sm:$0xff]  ;;  %v119_v17 = vld [vmem:[#allocation5 + $0x1b0] sm:$0xff]  ;;  %v184_v18 = vld [vmem:[#allocation5 + $0x3b8] sm:$0xff] }
  0x42   :  { %264 = vmatpush1.msra.mxu0 %v69_v53  ;;  %334 = vmatprep.subr.mxu1 %v134_v54  ;;  %v118_v19 = vld [vmem:[#allocation5 + $0x1a8] sm:$0xff]  ;;  %v183_v20 = vld [vmem:[#allocation5 + $0x3b0] sm:$0xff]  ;;  %v117_v21 = vld [vmem:[#allocation5 + $0x1a0] sm:$0xff] }
  0x43   :  { %265 = vmatprep.subr.mxu0 %v68_v55  ;;  %335 = vmatpush1.msra.mxu1 %v133_v56  ;;  %v182_v22 = vld [vmem:[#allocation5 + $0x3a8] sm:$0xff]  ;;  %v116_v23 = vld [vmem:[#allocation5 + $0x198] sm:$0xff]  ;;  %v181_v24 = vld [vmem:[#allocation5 + $0x3a0] sm:$0xff] }
  0x44   :  { %266 = vmatpush1.msra.mxu0 %v67_v57  ;;  %336 = vmatprep.subr.mxu1 %v132_v58  ;;  %v115_v25 = vld [vmem:[#allocation5 + $0x190] sm:$0xff]  ;;  %v180_v26 = vld [vmem:[#allocation5 + $0x398] sm:$0xff]  ;;  %v114_v27 = vld [vmem:[#allocation5 + $0x188] sm:$0xff] }
  0x45   :  { %267 = vmatprep.subr.mxu0 %v66_v59  ;;  %337 = vmatpush1.msra.mxu1 %v131_v60  ;;  %v179_v28 = vld [vmem:[#allocation5 + $0x390] sm:$0xff]  ;;  %v113_v29 = vld [vmem:[#allocation5 + $0x180] sm:$0xff]  ;;  %v178_v30 = vld [vmem:[#allocation5 + $0x388] sm:$0xff] }
  0x46   :  { %268 = vmatpush1.msra.mxu0 %v65_v61  ;;  %338 = vmatprep.subr.mxu1 %v130_v62  ;;  %v112_v31 = vld [vmem:[#allocation5 + $0x178] sm:$0xff]  ;;  %v177_v32 = vld [vmem:[#allocation5 + $0x380] sm:$0xff]  ;;  %v111_v33 = vld [vmem:[#allocation5 + $0x170] sm:$0xff] }
  0x47   :  { %269 = vmatprep.subr.mxu0 %v128_v63  ;;  %339 = vmatpush1.msra.mxu1 %v129_v0  ;;  %v176_v34 = vld [vmem:[#allocation5 + $0x378] sm:$0xff]  ;;  %v110_v35 = vld [vmem:[#allocation5 + $0x168] sm:$0xff]  ;;  %v175_v36 = vld [vmem:[#allocation5 + $0x370] sm:$0xff] }
  0x48   :  { %270 = vmatpush2.msra.mxu0 %v127_v1  ;;  %340 = vmatprep.subr.mxu1 %v192_v2  ;;  %v109_v37 = vld [vmem:[#allocation5 + $0x160] sm:$0xff]  ;;  %v174_v38 = vld [vmem:[#allocation5 + $0x368] sm:$0xff]  ;;  %v108_v39 = vld [vmem:[#allocation5 + $0x158] sm:$0xff] }
  0x49   :  { %271 = vmatprep.subr.mxu0 %v126_v3  ;;  %341 = vmatpush2.msra.mxu1 %v191_v4  ;;  %v173_v40 = vld [vmem:[#allocation5 + $0x360] sm:$0xff]  ;;  %v107_v41 = vld [vmem:[#allocation5 + $0x150] sm:$0xff]  ;;  %v172_v42 = vld [vmem:[#allocation5 + $0x358] sm:$0xff] }
  0x4a   :  { %272 = vmatpush2.msra.mxu0 %v125_v5  ;;  %342 = vmatprep.subr.mxu1 %v190_v6  ;;  %v106_v43 = vld [vmem:[#allocation5 + $0x148] sm:$0xff]  ;;  %v171_v44 = vld [vmem:[#allocation5 + $0x350] sm:$0xff]  ;;  %v105_v45 = vld [vmem:[#allocation5 + $0x140] sm:$0xff] }
  0x4b   :  { %273 = vmatprep.subr.mxu0 %v124_v7  ;;  %343 = vmatpush2.msra.mxu1 %v189_v8  ;;  %v170_v46 = vld [vmem:[#allocation5 + $0x348] sm:$0xff]  ;;  %v104_v47 = vld [vmem:[#allocation5 + $0x138] sm:$0xff]  ;;  %v169_v48 = vld [vmem:[#allocation5 + $0x340] sm:$0xff] }
  0x4c   :  { %274 = vmatpush2.msra.mxu0 %v123_v9  ;;  %344 = vmatprep.subr.mxu1 %v188_v10  ;;  %v103_v49 = vld [vmem:[#allocation5 + $0x130] sm:$0xff]  ;;  %v168_v50 = vld [vmem:[#allocation5 + $0x338] sm:$0xff]  ;;  %v102_v51 = vld [vmem:[#allocation5 + $0x128] sm:$0xff] }
  0x4d   :  { %275 = vmatprep.subr.mxu0 %v122_v11  ;;  %345 = vmatpush2.msra.mxu1 %v187_v12  ;;  %v167_v52 = vld [vmem:[#allocation5 + $0x330] sm:$0xff]  ;;  %v101_v53 = vld [vmem:[#allocation5 + $0x120] sm:$0xff]  ;;  %v166_v54 = vld [vmem:[#allocation5 + $0x328] sm:$0xff]  ;;  %v716_v11 = vmov 0.0  }
  0x4e   :  { %276 = vmatpush2.msra.mxu0 %v121_v13  ;;  %346 = vmatprep.subr.mxu1 %v186_v14  ;;  %v100_v55 = vld [vmem:[#allocation5 + $0x118] sm:$0xff]  ;;  %v165_v56 = vld [vmem:[#allocation5 + $0x320] sm:$0xff]  ;;  %v99_v57 = vld [vmem:[#allocation5 + $0x110] sm:$0xff] }
  0x4f   :  { %277 = vmatprep.subr.mxu0 %v120_v15  ;;  %347 = vmatpush2.msra.mxu1 %v185_v16  ;;  %v164_v58 = vld [vmem:[#allocation5 + $0x318] sm:$0xff]  ;;  %v98_v59 = vld [vmem:[#allocation5 + $0x108] sm:$0xff]  ;;  %v61_v60 = vld [vmem:[#allocation2 + $0x8] sm:$0xff] }
  0x50   :  { %278 = vmatpush2.msra.mxu0 %v119_v17  ;;  %348 = vmatprep.subr.mxu1 %v184_v18  ;;  %v97_v61 = vld [vmem:[#allocation5 + $0x100] sm:$0xff]  ;;  %v163_v62 = vld [vmem:[#allocation5 + $0x310] sm:$0xff]  ;;  %v60_v63 = vld [vmem:[#allocation2] sm:$0xff] }
  0x51   :  { %279 = vmatprep.subr.mxu0 %v118_v19  ;;  %349 = vmatpush2.msra.mxu1 %v183_v20  ;;  %v162_v0 = vld [vmem:[#allocation5 + $0x308] sm:$0xff]  ;;  %v224_v1 = vld [vmem:[#allocation5 + $0x4f8] sm:$0xff]  ;;  %v161_v2 = vld [vmem:[#allocation5 + $0x300] sm:$0xff] }
  0x52   :  { %280 = vmatpush2.msra.mxu0 %v117_v21  ;;  %350 = vmatprep.subr.mxu1 %v182_v22  ;;  %v63_v3 = vld [vmem:[#allocation2 + $0x18] sm:$0xff]  ;;  %v62_v5 = vld [vmem:[#allocation2 + $0x10] sm:$0xff]  ;;  %v221_v7 = vld [vmem:[#allocation5 + $0x4e0] sm:$0xff] }
  0x53   :  { %281 = vmatprep.subr.mxu0 %v116_v23  ;;  %351 = vmatpush2.msra.mxu1 %v181_v24  ;;  %v223_v4 = vld [vmem:[#allocation5 + $0x4f0] sm:$0xff]  ;;  %v222_v6 = vld [vmem:[#allocation5 + $0x4e8] sm:$0xff]  ;;  %v220_v8 = vld [vmem:[#allocation5 + $0x4d8] sm:$0xff] }
  0x54   :  { %282 = vmatpush2.msra.mxu0 %v115_v25  ;;  %352 = vmatprep.subr.mxu1 %v180_v26  ;;  %v219_v9 = vld [vmem:[#allocation5 + $0x4d0] sm:$0xff]  ;;  %v218_v10 = vld [vmem:[#allocation5 + $0x4c8] sm:$0xff]  ;;  %v217_v12 = vld [vmem:[#allocation5 + $0x4c0] sm:$0xff] }
  0x55   :  { %283 = vmatprep.subr.mxu0 %v114_v27  ;;  %353 = vmatpush2.msra.mxu1 %v179_v28  ;;  %v216_v13 = vld [vmem:[#allocation5 + $0x4b8] sm:$0xff]  ;;  %v215_v14 = vld [vmem:[#allocation5 + $0x4b0] sm:$0xff]  ;;  %v214_v15 = vld [vmem:[#allocation5 + $0x4a8] sm:$0xff] }
  0x56   :  { %284 = vmatpush2.msra.mxu0 %v113_v29  ;;  %354 = vmatprep.subr.mxu1 %v178_v30  ;;  %v213_v16 = vld [vmem:[#allocation5 + $0x4a0] sm:$0xff]  ;;  %v212_v17 = vld [vmem:[#allocation5 + $0x498] sm:$0xff]  ;;  %v211_v18 = vld [vmem:[#allocation5 + $0x490] sm:$0xff] }
  0x57   :  { %285 = vmatprep.subr.mxu0 %v112_v31  ;;  %355 = vmatpush2.msra.mxu1 %v177_v32  ;;  %v210_v19 = vld [vmem:[#allocation5 + $0x488] sm:$0xff]  ;;  %v209_v20 = vld [vmem:[#allocation5 + $0x480] sm:$0xff]  ;;  %v208_v21 = vld [vmem:[#allocation5 + $0x478] sm:$0xff] }
  0x58   :  { %286 = vmatpush2.msra.mxu0 %v111_v33  ;;  %356 = vmatprep.subr.mxu1 %v176_v34  ;;  %v207_v22 = vld [vmem:[#allocation5 + $0x470] sm:$0xff]  ;;  %v206_v23 = vld [vmem:[#allocation5 + $0x468] sm:$0xff]  ;;  %v205_v24 = vld [vmem:[#allocation5 + $0x460] sm:$0xff] }
  0x59   :  { %287 = vmatprep.subr.mxu0 %v110_v35  ;;  %357 = vmatpush2.msra.mxu1 %v175_v36  ;;  %v204_v25 = vld [vmem:[#allocation5 + $0x458] sm:$0xff]  ;;  %v203_v26 = vld [vmem:[#allocation5 + $0x450] sm:$0xff]  ;;  %v202_v27 = vld [vmem:[#allocation5 + $0x448] sm:$0xff] }
  0x5a   :  { %288 = vmatpush2.msra.mxu0 %v109_v37  ;;  %358 = vmatprep.subr.mxu1 %v174_v38  ;;  %v201_v28 = vld [vmem:[#allocation5 + $0x440] sm:$0xff]  ;;  %v200_v29 = vld [vmem:[#allocation5 + $0x438] sm:$0xff]  ;;  %v199_v30 = vld [vmem:[#allocation5 + $0x430] sm:$0xff] }
  0x5b   :  { %289 = vmatprep.subr.mxu0 %v108_v39  ;;  %359 = vmatpush2.msra.mxu1 %v173_v40  ;;  %v198_v31 = vld [vmem:[#allocation5 + $0x428] sm:$0xff]  ;;  %v197_v32 = vld [vmem:[#allocation5 + $0x420] sm:$0xff]  ;;  %v196_v33 = vld [vmem:[#allocation5 + $0x418] sm:$0xff] }
  0x5c   :  { %290 = vmatpush2.msra.mxu0 %v107_v41  ;;  %360 = vmatprep.subr.mxu1 %v172_v42  ;;  %v195_v34 = vld [vmem:[#allocation5 + $0x410] sm:$0xff]  ;;  %v194_v35 = vld [vmem:[#allocation5 + $0x408] sm:$0xff]  ;;  %v193_v36 = vld [vmem:[#allocation5 + $0x400] sm:$0xff] }
  0x5d   :  { %291 = vmatprep.subr.mxu0 %v106_v43  ;;  %361 = vmatpush2.msra.mxu1 %v171_v44  ;;  %v64_v37 = vld [vmem:[#allocation2 + $0x20] sm:$0xff]  ;;  %v482_v40 = vld [vmem:[#allocation7 + $0xf0] sm:$0xff]  ;;  %v481_v42 = vld [vmem:[#allocation7 + $0xe8] sm:$0xff] }
  0x5e   :  { %292 = vmatpush2.msra.mxu0 %v105_v45  ;;  %362 = vmatprep.subr.mxu1 %v170_v46  ;;  %v483_v38 = vld [vmem:[#allocation7 + $0xf8] sm:$0xff]  ;;  %v466_v41 = vld [vmem:[#allocation7 + $0x70] sm:$0xff]  ;;  %v465_v43 = vld [vmem:[#allocation7 + $0x68] sm:$0xff] }
  0x5f   :  { %293 = vmatprep.subr.mxu0 %v104_v47  ;;  %363 = vmatpush2.msra.mxu1 %v169_v48  ;;  %v467_v39 = vld [vmem:[#allocation7 + $0x78] sm:$0xff]  ;;  %v480_v44 = vld [vmem:[#allocation7 + $0xe0] sm:$0xff]  ;;  %v478_v48 = vld [vmem:[#allocation7 + $0xd0] sm:$0xff] }
  0x60   :  { %294 = vmatpush2.msra.mxu0 %v103_v49  ;;  %364 = vmatprep.subr.mxu1 %v168_v50  ;;  %v464_v45 = vld [vmem:[#allocation7 + $0x60] sm:$0xff]  ;;  %v479_v46 = vld [vmem:[#allocation7 + $0xd8] sm:$0xff]  ;;  %v462_v49 = vld [vmem:[#allocation7 + $0x50] sm:$0xff] }
  0x61   :  { %295 = vmatprep.subr.mxu0 %v102_v51  ;;  %365 = vmatpush2.msra.mxu1 %v167_v52  ;;  %v463_v47 = vld [vmem:[#allocation7 + $0x58] sm:$0xff]  ;;  %v477_v50 = vld [vmem:[#allocation7 + $0xc8] sm:$0xff]  ;;  %v476_v52 = vld [vmem:[#allocation7 + $0xc0] sm:$0xff] }
  0x62   :  { %296 = vmatpush2.msra.mxu0 %v101_v53  ;;  %366 = vmatprep.subr.mxu1 %v166_v54  ;;  %v461_v51 = vld [vmem:[#allocation7 + $0x48] sm:$0xff]  ;;  %v460_v53 = vld [vmem:[#allocation7 + $0x40] sm:$0xff]  ;;  %v475_v54 = vld [vmem:[#allocation7 + $0xb8] sm:$0xff] }
  0x63   :  { %297 = vmatprep.subr.mxu0 %v100_v55  ;;  %367 = vmatpush2.msra.mxu1 %v165_v56  ;;  %v459_v55 = vld [vmem:[#allocation7 + $0x38] sm:$0xff]  ;;  %v474_v56 = vld [vmem:[#allocation7 + $0xb0] sm:$0xff] }
  0x64   :  { %298 = vmatpush2.msra.mxu0 %v99_v57  ;;  %368 = vmatprep.subr.mxu1 %v164_v58  ;;  %v458_v57 = vld [vmem:[#allocation7 + $0x30] sm:$0xff]  ;;  %v473_v58 = vld [vmem:[#allocation7 + $0xa8] sm:$0xff] }
  0x65   :  { %299 = vmatprep.subr.mxu0 %v98_v59  ;;  %301 = vmatprep.mubr.f32.mxu0 %v61_v60  ;;  %v457_v59 = vld [vmem:[#allocation7 + $0x28] sm:$0xff]  ;;  %v472_v60 = vld [vmem:[#allocation7 + $0xa0] sm:$0xff] }
  0x66   :  { %300 = vmatpush2.msra.mxu0 %v97_v61  ;;  %369 = vmatpush2.msra.mxu1 %v163_v62  ;;  %v456_v61 = vld [vmem:[#allocation7 + $0x20] sm:$0xff]  ;;  %v471_v62 = vld [vmem:[#allocation7 + $0x98] sm:$0xff] }
  0x67   :  { %302 = vmatmul.mubr.f32.vlgmr.msra.gmra.mxu0 %v60_v63  ;;  %370 = vmatprep.subr.mxu1 %v162_v0  ;;  %v455_v63 = vld [vmem:[#allocation7 + $0x18] sm:$0xff]  ;;  %v470_v0 = vld [vmem:[#allocation7 + $0x90] sm:$0xff] }
  0x68   :  { %379 = vmatprep.subr.mxu0 %v224_v1  ;;  %371 = vmatpush2.msra.mxu1 %v161_v2  ;;  %v454_v1 = vld [vmem:[#allocation7 + $0x10] sm:$0xff]  ;;  %v469_v2 = vld [vmem:[#allocation7 + $0x88] sm:$0xff] }
  0x69   :  { %372 = vmatprep.mubr.f32.mxu1 %v63_v3  ;;  %380 = vmatpush1.msra.mxu0 %v223_v4  ;;  %v453_v3 = vld [vmem:[#allocation7 + $0x8] sm:$0xff]  ;;  %v468_v4 = vld [vmem:[#allocation7 + $0x80] sm:$0xff] }
  0x6a   :  { %373 = vmatmul.mubr.f32.vlgmr.msra.gmra.mxu1 %v62_v5  ;;  %381 = vmatprep.subr.mxu0 %v222_v6  ;;  %v452_v5 = vld [vmem:[#allocation7] sm:$0xff]  ;;  %v227_v6 = vlaneseq }
  0x6b   :  { %382 = vmatpush1.msra.mxu0 %v221_v7  ;;  %443 = vmatprep.mubr.f32.mxu0 %v716_v11 }
  0x6c   :  { %383 = vmatprep.subr.mxu0 %v220_v8  ;;  %579 = vmatprep.subr.mxu1 %v483_v38  ;;  %v228_v7 = vshrl.u32 %v227_v6, 7 }
  0x6d   :  { %384 = vmatpush1.msra.mxu0 %v219_v9  ;;  %580 = vmatpush3.msra.mxu1 %v467_v39  ;;  %v225_v9 = vld [vmem:[%s768_s2] sm:$0x3] }
  0x6e   :  { %385 = vmatprep.subr.mxu0 %v218_v10  ;;  %581 = vmatprep.subr.mxu1 %v482_v40  ;;  %v229_v8 = vsub.s32 0, %v228_v7  ;;  %v233_v10 = vsub.s32 1, %v228_v7 }
  0x6f   :  { %386 = vmatpush1.msra.mxu0 %v217_v12  ;;  %582 = vmatpush3.msra.mxu1 %v466_v41 }
  0x70   :  { %387 = vmatprep.subr.mxu0 %v216_v13  ;;  %583 = vmatprep.subr.mxu1 %v481_v42  ;;  %v230_v12 = vrot.slane %v225_v9, %v229_v8  ;;  %v234_v13 = vrot.slane %v225_v9, %v233_v10 }
  0x71   :  { %388 = vmatpush1.msra.mxu0 %v215_v14  ;;  %584 = vmatpush3.msra.mxu1 %v465_v43 }
  0x72   :  { %389 = vmatprep.subr.mxu0 %v214_v15  ;;  %585 = vmatprep.subr.mxu1 %v480_v44 }
  0x73   :  { %390 = vmatpush1.msra.mxu0 %v213_v16  ;;  %586 = vmatpush3.msra.mxu1 %v464_v45 }
  0x74   :  { %391 = vmatprep.subr.mxu0 %v212_v17  ;;  %587 = vmatprep.subr.mxu1 %v479_v46 }
  0x75   :  { %392 = vmatpush1.msra.mxu0 %v211_v18  ;;  %588 = vmatpush3.msra.mxu1 %v463_v47 }
  0x76   :  { %393 = vmatprep.subr.mxu0 %v210_v19  ;;  %589 = vmatprep.subr.mxu1 %v478_v48 }
  0x77   :  { %394 = vmatpush1.msra.mxu0 %v209_v20  ;;  %590 = vmatpush3.msra.mxu1 %v462_v49 }
  0x78   :  { %395 = vmatprep.subr.mxu0 %v208_v21  ;;  %591 = vmatprep.subr.mxu1 %v477_v50 }
  0x79   :  { %396 = vmatpush1.msra.mxu0 %v207_v22  ;;  %592 = vmatpush3.msra.mxu1 %v461_v51 }
  0x7a   :  { %397 = vmatprep.subr.mxu0 %v206_v23  ;;  %593 = vmatprep.subr.mxu1 %v476_v52 }
  0x7b   :  { %398 = vmatpush1.msra.mxu0 %v205_v24  ;;  %594 = vmatpush3.msra.mxu1 %v460_v53 }
  0x7c   :  { %399 = vmatprep.subr.mxu0 %v204_v25  ;;  %595 = vmatprep.subr.mxu1 %v475_v54 }
  0x7d   :  { %400 = vmatpush1.msra.mxu0 %v203_v26  ;;  %596 = vmatpush3.msra.mxu1 %v459_v55 }
  0x7e   :  { %401 = vmatprep.subr.mxu0 %v202_v27  ;;  %597 = vmatprep.subr.mxu1 %v474_v56 }
  0x7f   :  { %402 = vmatpush1.msra.mxu0 %v201_v28  ;;  %598 = vmatpush3.msra.mxu1 %v458_v57  ;;  %v578_v28 = vld [vmem:[%s770_s4] ss:$0 sm:$0xff] }
  0x80   :  { %403 = vmatprep.subr.mxu0 %v200_v29  ;;  %599 = vmatprep.subr.mxu1 %v473_v58 }
  0x81   :  { %404 = vmatpush1.msra.mxu0 %v199_v30  ;;  %600 = vmatpush3.msra.mxu1 %v457_v59 }
  0x82   :  { %405 = vmatprep.subr.mxu0 %v198_v31  ;;  %601 = vmatprep.subr.mxu1 %v472_v60 }
  0x83   :  { %406 = vmatpush1.msra.mxu0 %v197_v32  ;;  %602 = vmatpush3.msra.mxu1 %v456_v61 }
  0x84   :  { %407 = vmatprep.subr.mxu0 %v196_v33  ;;  %603 = vmatprep.subr.mxu1 %v471_v62 }
  0x85   :  { %408 = vmatpush1.msra.mxu0 %v195_v34  ;;  %604 = vmatpush3.msra.mxu1 %v455_v63 }
  0x86   :  { %409 = vmatprep.subr.mxu0 %v194_v35  ;;  %605 = vmatprep.subr.mxu1 %v470_v0 }
  0x87   :  { %410 = vmatpush1.msra.mxu0 %v193_v36  ;;  %606 = vmatpush3.msra.mxu1 %v454_v1 }
  0x88   :  { %444 = vmatmul.mubr.f32.vlgmr.msra.gmra.mxu0 %v64_v37  ;;  %607 = vmatprep.subr.mxu1 %v469_v2 }
  0x89   :  { %608 = vmatpush3.msra.mxu1 %v453_v3 }
  0x8a   :  { %609 = vmatprep.subr.mxu1 %v468_v4 }
  0x8b   :  { %610 = vmatpush3.msra.mxu1 %v452_v5 }
 0x127   :  { %v303_v11 = vpop.f32.mrf.mxu0 }
 0x128   :  { %v304_v16 = vadd.f32 %v303_v11, %v230_v12 }
 0x129   :  { %v305_v14 = vpop.f32.mrf.mxu0 }
 0x12a   :  { %v374_v15 = vpop.f32.mrf.mxu1  ;;  %v306_v17 = vadd.f32 %v305_v14, %v234_v13 }
 0x12b   :  { %v375_v19 = vadd.f32 %v374_v15, %v304_v16 }
 0x12c   :  { %v376_v18 = vpop.f32.mrf.mxu1 }
 0x12d   :  { %v377_v21 = vadd.f32 %v376_v18, %v306_v17 }
 0x148   :  { %v445_v20 = vpop.f32.mrf.mxu0 }
 0x149   :  { %v446_v22 = vadd.f32 %v445_v20, %v375_v19 }
 0x14a   :  { %v447_v23 = vpop.f32.mrf.mxu0 }
 0x14b   :  { %v448_v24 = vadd.f32 %v447_v23, %v377_v21  ;;  %v450_v26 = vmax.f32 %v446_v22, 0.0 }
 0x14d   :  { %v451_v25 = vmax.f32 %v448_v24, 0.0 }
 0x14f   :  { %555 = vmatprep.mubr.f32.mxu1 %v451_v25 }
 0x150   :  { %556 = vmatmul.mubr.f32.vlgmr.msra.gmra.mxu1 %v450_v26 }
 0x210   :  { %v611_v27 = vpop.f32.mrf.mxu1 }
 0x212   :  { %v612_v29 = vpop.f32.mrf.mxu1 }
 0x213   :  { %v613_v30 = vadd.f32 %v612_v29, %v611_v27 }
 0x215   :  { %v558_v31 = vadd.f32 %v613_v30, %v578_v28 }
 0x217   :  { %561 = vst [vmem:[#allocation8] sm:$0xff] %v558_v31 }
 0x218   :  { %694 = shalt.err (!%p691_p5)
}
 0x219   :  { %571 = dma.vmem_to_hbm [thread:$0]  %s569_s13, 128, %s771_s5, [#allocation4]  }
 0x21a   :  { %707 = dma.done.wait [#allocation4], 128  }
 0x21b   :  { %708 = vsyncadd [#allocation4], 4294967168 }
 0x21c   :  { %575 = vsyncpa [#allocation3], 1 }
 0x21d   :  { %576 = vsyncpa [#allocation6], 1 }
 0x21e   :  { %577 = vsyncpa [#allocation4], 1 }

</bundles_post_ra>
